<compile_context>
chip_gen: v7x
topology: tpu7x:2x2x1
jax: 0.10.0
libtpu: 0.0.40
codegen_flags: <defaults>
</compile_context>

<pallas_src>
import functools

import jax
import jax.numpy as jnp
import numpy as np
from jax import lax
from jax.experimental import pallas as pl
from jax.experimental.pallas import tpu as pltpu


# --------------------------------------------------------------------------
# kernels
# --------------------------------------------------------------------------
def _patch_embed_norm_kernel(x_ref, g_ref, b_ref, o_ref, *, eps):
    # x_ref: (bt, C, hw_t);  g_ref/b_ref: (1, C);  o_ref: (bt, hw_t, C)
    y = jnp.transpose(x_ref[...], (0, 2, 1)).astype(jnp.float32)   # (bt, hw_t, C)
    mean = jnp.mean(y, axis=-1, keepdims=True)                     # XLU reduce
    d = y - mean
    var = jnp.mean(d * d, axis=-1, keepdims=True)
    inv = lax.rsqrt(var + jnp.float32(eps))                        # EUP
    gamma = g_ref[...].astype(jnp.float32)                         # (1, C)
    beta = b_ref[...].astype(jnp.float32)
    o_ref[...] = (d * inv * gamma + beta).astype(o_ref.dtype)


def _patch_embed_plain_kernel(x_ref, o_ref):
    # norm_layer=None: just the flatten + transpose
    o_ref[...] = jnp.transpose(x_ref[...], (0, 2, 1))


# --------------------------------------------------------------------------
# tiling heuristic
# --------------------------------------------------------------------------
def _choose_tiles(b, c, hw, itemsize, budget_bytes=2 << 20):
    """Pick (batch_tile, hw_tile) so one block stays within ~budget_bytes of
    VMEM (double-buffered in+out + f32 temps then fit the scoped limit) while
    keeping >= 2 grid steps for megacore whenever possible."""
    img_bytes = c * hw * itemsize
    if img_bytes <= budget_bytes:
        # One or more whole images per step.
        bt = int(min(b, max(1, budget_bytes // img_bytes), 8))
        if b > 1:
            bt = min(bt, max(1, b // 2))       # keep >= 2 grid steps
        while b % bt:                          # prefer an even split
            bt -= 1
        return bt, hw
    # Image too large for one block: tile HW in multiples of 128.
    hw_t = (budget_bytes // (c * itemsize)) // 128 * 128
    hw_t = int(max(128, min(hw_t, hw)))
    return 1, hw_t


# --------------------------------------------------------------------------
# wrapper
# --------------------------------------------------------------------------
def patch_embed(x, gamma=None, beta=None, *, eps=1e-5):
    """Pallas equivalent of PatchEmbed.forward.

    x:            (B, C, H, W) feature map (C == embed_dim in BiSwinIR usage)
    gamma, beta:  optional (C,) LayerNorm affine params (norm_layer=nn.LayerNorm).
                  If None -> norm_layer=None (pure flatten + transpose).
    returns:      (B, H*W, C)
    """
    b, c, h, w = x.shape
    hw = h * w
    x2 = x.reshape(b, c, hw)                   # flatten(2): free reshape

    itemsize = jnp.dtype(x.dtype).itemsize
    bt, hw_t = _choose_tiles(b, c, hw, itemsize)
    grid = (pl.cdiv(b, bt), pl.cdiv(hw, hw_t))

    in_specs = [pl.BlockSpec((bt, c, hw_t), lambda i, j: (i, 0, j))]
    out_spec = pl.BlockSpec((bt, hw_t, c), lambda i, j: (i, j, 0))
    out_shape = jax.ShapeDtypeStruct((b, hw, c), x.dtype)

    bytes_accessed = 2 * b * c * hw * itemsize

    if gamma is not None:
        gamma2 = jnp.asarray(gamma).reshape(1, c)
        beta2 = jnp.asarray(beta).reshape(1, c)
        in_specs += [
            pl.BlockSpec((1, c), lambda i, j: (0, 0)),
            pl.BlockSpec((1, c), lambda i, j: (0, 0)),
        ]
        kernel = functools.partial(_patch_embed_norm_kernel, eps=eps)
        args = (x2, gamma2, beta2)
        cost = pl.CostEstimate(flops=7 * b * hw * c,
                               transcendentals=b * hw,
                               bytes_accessed=bytes_accessed)
    else:
        kernel = _patch_embed_plain_kernel
        args = (x2,)
        cost = pl.CostEstimate(flops=0, transcendentals=0,
                               bytes_accessed=bytes_accessed)

    return pl.pallas_call(
        kernel,
        out_shape=out_shape,
        grid=grid,
        in_specs=in_specs,
        out_specs=out_spec,
        compiler_params=pltpu.CompilerParams(
            dimension_semantics=("parallel", "parallel"),
            vmem_limit_bytes=32 * 1024 * 1024),
        cost_estimate=cost,
    )(*args)


# --------------------------------------------------------------------------
# pure-JAX reference of the PyTorch forward
# --------------------------------------------------------------------------
def _reference(x, gamma=None, beta=None, eps=1e-5):
    b, c, h, w = x.shape
    y = jnp.transpose(x.reshape(b, c, h * w), (0, 2, 1))    # (B, HW, C)
    if gamma is None:
        return y
    yf = y.astype(jnp.float32)
    mean = jnp.mean(yf, axis=-1, keepdims=True)
    var = jnp.mean((yf - mean) ** 2, axis=-1, keepdims=True)
    out = (yf - mean) / jnp.sqrt(var + eps) * gamma + beta
    return out.astype(x.dtype)


if __name__ == "__main__":
    key = jax.random.PRNGKey(0)

    # Case 1: small, lane-dense embed_dim=128 (both norm and plain paths).
    b, embed_dim, h, w = 2, 128, 16, 16
    k1, k2, k3, k4, k5 = jax.random.split(key, 5)
    x = jax.random.normal(k1, (b, embed_dim, h, w), dtype=jnp.float32)
    gamma = 1.0 + 0.1 * jax.random.normal(k2, (embed_dim,), dtype=jnp.float32)
    beta = 0.1 * jax.random.normal(k3, (embed_dim,), dtype=jnp.float32)

    out_plain = patch_embed(x)                       # norm_layer=None
    out_norm = patch_embed(x, gamma, beta)           # norm_layer=nn.LayerNorm
    jax.block_until_ready((out_plain, out_norm))
    np.testing.assert_array_equal(np.asarray(out_plain),
                                  np.asarray(_reference(x)))
    np.testing.assert_allclose(np.asarray(out_norm),
                               np.asarray(_reference(x, gamma, beta)),
                               rtol=1e-5, atol=1e-5)

    # Case 2: non-128-aligned dims (embed_dim=96, HW=100) -> full-extent blocks.
    x2 = jax.random.normal(k4, (2, 96, 10, 10), dtype=jnp.float32)
    g2 = 1.0 + 0.1 * jax.random.normal(k5, (96,), dtype=jnp.float32)
    b2 = jnp.zeros((96,), dtype=jnp.float32)
    out2 = patch_embed(x2, g2, b2)
    jax.block_until_ready(out2)
    np.testing.assert_allclose(np.asarray(out2),
                               np.asarray(_reference(x2, g2, b2)),
                               rtol=1e-5, atol=1e-5)

    # Case 3: large feature map (batch=1) -> exercises the HW-tiling path.
    x3 = jax.random.normal(k1, (1, 128, 64, 128), dtype=jnp.float32)
    out3 = patch_embed(x3, gamma, beta)
    jax.block_until_ready(out3)
    np.testing.assert_allclose(np.asarray(out3),
                               np.asarray(_reference(x3, gamma, beta)),
                               rtol=1e-5, atol=1e-5)

    print("KERNEL_OK")
</pallas_src>

<mosaic_0001>
module attributes {stable_mosaic.version = 11 : i64} {
  func.func @_patch_embed_plain_kernel(%arg0: i32, %arg1: i32, %arg2: memref<1x128x256xf32, #tpu.memory_space<vmem>>, %arg3: memref<1x256x128xf32, #tpu.memory_space<vmem>>) attributes {dimension_semantics = [#tpu.dimension_semantics<parallel>, #tpu.dimension_semantics<parallel>], iteration_bounds = array<i64: 2, 1>, scalar_prefetch = 0 : i64, scratch_operands = 0 : i64, tpu.core_type = #tpu.core_type<tc>, window_params = [{transform_indices = @transform_0, window_bounds = array<i64: 1, 128, 256>}, {transform_indices = @transform_1, window_bounds = array<i64: 1, 256, 128>}]} {
    %c0 = arith.constant 0 : index
    %c0_0 = arith.constant 0 : index
    %c0_1 = arith.constant 0 : index
    %0 = vector.load %arg2[%c0, %c0_0, %c0_1] : memref<1x128x256xf32, #tpu.memory_space<vmem>>, vector<1x128x256xf32>
    %1 = tpu.transpose %0, [0, 2, 1] : vector<1x128x256xf32> -> vector<1x256x128xf32>
    %c0_2 = arith.constant 0 : index
    %c0_3 = arith.constant 0 : index
    %c0_4 = arith.constant 0 : index
    %2 = vector.load %arg3[%c0_2, %c0_3, %c0_4] : memref<1x256x128xf32, #tpu.memory_space<vmem>>, vector<1x256x128xf32>
    tpu.vector_store %arg3[%c0_2, %c0_3, %c0_4], %1 {strides = array<i32>} : memref<1x256x128xf32, #tpu.memory_space<vmem>>, vector<1x256x128xf32>,
    return
  }
  func.func @transform_0(%arg0: i32, %arg1: i32) -> (i32, i32, i32) {
    %c0_i32 = arith.constant 0 : i32
    %c0_i32_0 = arith.constant 0 : i32
    return %arg0, %c0_i32, %arg1 : i32, i32, i32
  }
  func.func @transform_1(%arg0: i32, %arg1: i32) -> (i32, i32, i32) {
    %c0_i32 = arith.constant 0 : i32
    %c0_i32_0 = arith.constant 0 : i32
    return %arg0, %arg1, %c0_i32 : i32, i32, i32
  }
}

</mosaic_0001>

<bundles_post_ra>
// kernel: tpu_custom_call.1
= control target key start
LH: loop header
LB: loop body
LE: loop exit
PB: predicated region body
PF: predicated region fallthrough
CT: control target
= control target key end

     0   :  { %6 = vsyncpa [#allocation3], 0  ;;  %s847_s0 = inlined_call_operand.hbm [shape: f32[2,128,256], index: 0, kind: input, shape index: {}]   ;;  %s848_s1 = inlined_call_operand.hbm [shape: f32[2,256,128], index: 1, kind: output, shape index: {}]  }
   0x1   :  { %8 = vsyncpa [#allocation3 + $0x1], 0 }
   0x2   :  { %9 = vsyncpa [#allocation4], 0 }
   0x3   :  { %11 = vsyncpa [#allocation4 + $0x1], 0  ;;  %s599_s6 = smov 0   ;;  %s601_s7 = smov 0  }
   0x4   :  { %s603_s8 = smov 0   ;;  %s605_s9 = smov 0  }
   0x5   :  { %s607_s10 = smov 0   ;;  %s609_s11 = smov 0  }
   0x6 LB: > { %s386_s12 = sadd.s32 4294967295, %s581_s11   ;;  %s387_s13 = sadd.s32 4294967294, %s581_s11   ;;  %s581_s11 = sphi %s609_s11, %s17_s11   ;;  %s577_s10 = sphi %s607_s10, %s863_s10   ;;  %s573_s9 = sphi %s605_s9, %s862_s9   ;;  %s569_s8 = sphi %s603_s8, %s861_s8   ;;  %s565_s7 = sphi %s601_s7, %s860_s7   ;;  %s561_s6 = sphi %s599_s6, %s859_s6  }
   0x7   : > { %s29_s14 = sadd.s32 1, %s577_s10  ;;  %s38_s15 = sadd.s32 1, %s569_s8 }
   0x8   : > { %p31_p0 = scmp.ge.s32.totalorder %s29_s14, 2  ;;  %p45_p1 = scmp.ne.s32.totalorder %s569_s8, %s565_s7 }
   0x9   : > { %p46_p2 = scmp.eq.s32.totalorder %s581_s11, 0  ;;  %p51_p3 = scmp.ne.s32.totalorder %s565_s7, %s561_s6 }
   0xa   : > { %s865_s14 = smov (%p31_p0, %s29_s14), 0  ;;  %p52_p5 = scmp.eq.s32.totalorder %s386_s12, 0 }
   0xb   : > { %p640_p4 = por %p46_p2, %p45_p1  ;;  %s33_s17 = ssub.s32 %s577_s10, %s865_s14 }
   0xc   : > { %p77_p6 = scmp.eq.s32.totalorder %s386_s12, 1  ;;  %p36_p7 = scmp.eq.s32.totalorder %s33_s17, 0 }
   0xd   : > { %p646_p8 = por %p52_p5, %p51_p3  ;;  %p83_p10 = scmp.eq.s32.totalorder %s387_s13, 1 }
   0xe   : > { %p650_p9 = por %p77_p6, %p45_p1  ;;  %p415_p13 = scmp.lt.s32.totalorder %s581_s11, 2 }
   0xf   : > { %s655_s20 = scalar_select %p36_p7, %s569_s8, %s38_s15  }
  0x10   : > { %s852_s19 = scalar_select %p650_p9, 1, 0 }
  0x11   : > { %p657_p11 = por %p83_p10, %p51_p3  ;;  %s103_s22 = sand.u32 1, %s569_s8  }
  0x12   : > { %s390_s23 = sshll.u32 %s103_s22, 8  ;;  %s401_s24 = sshll.u32 %s577_s10, 12 }
  0x13   : > { %s853_s21 = scalar_select %p657_p11, 1, 0 }
  0x14   : > { %s668_s27 = scalar_lea.hbm %s847_s0, %s401_s24  ;;  %s107_s28 = scalar_lea.vmem [#allocation2], %s390_s23 }
  0x15   : > { %s116_s29 = sshll.u32 %s107_s28, 4  ;;  %p674_p0 = pnand %p415_p13, %p640_p4  ;;  %s670_s29 = int_to_ptr.vmem [resolvable:$true] %s116_s29 }
  0x16   : > { %s679_s2 = scalar_lea.sflag [#allocation3], %s103_s22  ;;  %s469_s3 = scalar_lea.hbm %s668_s27, 4096 }
  0x17   : > { %p470_p2 = scmp.ne.s32.totalorder %s668_s27, %s469_s3  ;;  %p471_p3 = pneg %p674_p0 }
  0x18   : > { %s474_s12 = scalar_lea.hbm %s847_s0, 8192  ;;  %p475_p4 = scmp.lt.u32.totalorder %s668_s27, %s847_s0 }
  0x19   : > { %p472_p5 = pnand %p471_p3, %p470_p2  ;;  %p476_p7 = scmp.lt.u32.totalorder %s474_s12, %s469_s3 }
  0x1a   : > { %p478_p13 = scmp.lt.u32.totalorder %s469_s3, %s668_s27 }
  0x1b   : > { %p473_p6 = pneg %p472_p5  ;;  %p477_p10 = por %p476_p7, %p475_p4 }
  0x1d   : > { %p479_p12 = por %p478_p13, %p477_p10 }
  0x1f   : > { %p480_p1 = pnand %p479_p12, %p473_p6 }
  0x21   : > { %483 = shalt.err (!%p480_p1)
}
  0x22   : > { %s484_s16 = scalar_lea.vmem %s670_s29, 4096  ;;  %s583_s17 = smov [#allocation2]  }
  0x23   : > { %p485_p2 = scmp.ne.s32.totalorder %s670_s29, %s484_s16  ;;  %s489_s22 = sshll.u32 %s583_s17, 4  ;;  %s490_s22 = int_to_ptr.vmem [resolvable:$false] %s489_s22 }
  0x24   : > { %s491_s23 = scalar_lea.vmem %s490_s22, 8192  ;;  %p492_p9 = scmp.lt.s32.totalorder %s670_s29, %s490_s22 }
  0x25   : > { %p487_p5 = pnand %p485_p2, %p471_p3  ;;  %p493_p4 = scmp.lt.s32.totalorder %s491_s23, %s484_s16 }
  0x27   : > { %p488_p11 = pneg %p487_p5  ;;  %p494_p7 = por %p493_p4, %p492_p9 }
  0x29   : > { %p495_p10 = pnand %p494_p7, %p488_p11 }
  0x2b   : > { %498 = shalt.err (!%p495_p10)
}
  0x2c   : > { %s584_s24 = smov 256   ;;  %s585_s25 = smov 16  }
  0x2d   : > { %410 = dma.hbm_to_vmem [thread:$0]  (!%p674_p0), %s668_s27, 4096, %s670_s29, %s679_s2, %s584_s24, %s584_s24, %s585_s25  }
  0x2e   : > { %p124_p12 = scmp.lt.s32.totalorder %s581_s11, 3  ;;  %p855_p1 = scmp.ge.s32.totalorder %s581_s11, 1 }
  0x30   : > { %p125_p3 = pnand %p855_p1, %p124_p12 }
  0x31   : > { %s711_s26 = sand.u32 (!%p125_p3), 1, %s565_s7  }
  0x32   : > { %128 = sbr.rel (%p125_p3) target bundleno = 263 (0x107), region = 24  ;;  %s394_s28 = sshll.u32 (!%p125_p3), %s711_s26, 8 }
  0x33   : > { %s131_s3 = scalar_lea.sflag (!%p125_p3), [#allocation3], %s711_s26  ;;  %s717_s4 = scalar_lea.vmem (!%p125_p3), [#allocation2], %s394_s28 }
  0x39   : > { %552 = dma.done.wait (%p646_p8), %s131_s3, 4096  }
  0x3a   : > { %554 = vsyncadd (%p646_p8), %s131_s3, 4294963200  ;;  %v156_v0 = vld [vmem:[%s717_s4 + $0x8] sm:$0xff]  ;;  %v155_v1 = vld [vmem:[%s717_s4] sm:$0xff]  ;;  %s757_s18 = scalar_lea.vmem [#allocation5], %s394_s28  ;;  %s402_s27 = sshll.u32 %s573_s9, 12 }
  0x3b   : > { %219 = vxpose.xlu1.b32.start [1/16] %v156_v0, 128  ;;  %187 = vxpose.xlu0.b32.start [1/16] %v155_v1, 128  ;;  %v158_v2 = vld [vmem:[%s717_s4 + $0x18] sm:$0xff]  ;;  %v157_v3 = vld [vmem:[%s717_s4 + $0x10] sm:$0xff]  ;;  %v160_v4 = vld [vmem:[%s717_s4 + $0x28] sm:$0xff]  ;;  %s299_s29 = sshll.u32 %s757_s18, 4  ;;  %s794_s5 = scalar_lea.hbm %s848_s1, %s402_s27  ;;  %s796_s29 = int_to_ptr.vmem [resolvable:$true] %s299_s29 }
  0x3c   : > { %v159_v5 = vld [vmem:[%s717_s4 + $0x20] sm:$0xff]  ;;  %v162_v6 = vld [vmem:[%s717_s4 + $0x38] sm:$0xff]  ;;  %v161_v7 = vld [vmem:[%s717_s4 + $0x30] sm:$0xff]  ;;  %s284_s9 = scalar_lea.sflag [#allocation4], %s711_s26  ;;  %s499_s12 = scalar_lea.vmem %s796_s29, 4096 }
  0x3d   : > { %v164_v8 = vld [vmem:[%s717_s4 + $0x48] sm:$0xff]  ;;  %v163_v9 = vld [vmem:[%s717_s4 + $0x40] sm:$0xff]  ;;  %v166_v10 = vld [vmem:[%s717_s4 + $0x58] sm:$0xff]  ;;  %p500_p8 = scmp.ne.s32.totalorder %s796_s29, %s499_s12  ;;  %p856_p9 = scmp.ne.s32.totalorder %s852_s19, 0 }
  0x3e   : > { %v165_v11 = vld [vmem:[%s717_s4 + $0x50] sm:$0xff]  ;;  %v168_v12 = vld [vmem:[%s717_s4 + $0x68] sm:$0xff]  ;;  %v167_v13 = vld [vmem:[%s717_s4 + $0x60] sm:$0xff]  ;;  %s586_s13 = smov [#allocation5]  }
  0x3f   : > { %220 = vxpose.xlu1.b32.cont [2/16] %v158_v2, 128  ;;  %188 = vxpose.xlu0.b32.cont [2/16] %v157_v3, 128  ;;  %v170_v14 = vld [vmem:[%s717_s4 + $0x78] sm:$0xff]  ;;  %v169_v15 = vld [vmem:[%s717_s4 + $0x70] sm:$0xff]  ;;  %v172_v16 = vld [vmem:[%s717_s4 + $0x88] sm:$0xff]  ;;  %p501_p11 = pnand %p500_p8, %p856_p9  ;;  %s503_s15 = sshll.u32 %s586_s13, 4  ;;  %s504_s15 = int_to_ptr.vmem [resolvable:$false] %s503_s15 }
  0x40   : > { %v171_v17 = vld [vmem:[%s717_s4 + $0x80] sm:$0xff]  ;;  %v174_v18 = vld [vmem:[%s717_s4 + $0x98] sm:$0xff]  ;;  %v173_v19 = vld [vmem:[%s717_s4 + $0x90] sm:$0xff]  ;;  %s505_s16 = scalar_lea.vmem %s504_s15, 8192  ;;  %p506_p6 = scmp.lt.s32.totalorder %s796_s29, %s504_s15 }
  0x41   : > { %v176_v20 = vld [vmem:[%s717_s4 + $0xa8] sm:$0xff]  ;;  %v175_v21 = vld [vmem:[%s717_s4 + $0xa0] sm:$0xff]  ;;  %v178_v22 = vld [vmem:[%s717_s4 + $0xb8] sm:$0xff]  ;;  %p502_p0 = pneg %p501_p11  ;;  %p507_p13 = scmp.lt.s32.totalorder %s505_s16, %s499_s12 }
  0x42   : > { %v177_v23 = vld [vmem:[%s717_s4 + $0xb0] sm:$0xff]  ;;  %v180_v24 = vld [vmem:[%s717_s4 + $0xc8] sm:$0xff]  ;;  %v179_v25 = vld [vmem:[%s717_s4 + $0xc0] sm:$0xff] }
  0x43   : > { %221 = vxpose.xlu1.b32.cont [3/16] %v160_v4, 128  ;;  %189 = vxpose.xlu0.b32.cont [3/16] %v159_v5, 128  ;;  %v182_v26 = vld [vmem:[%s717_s4 + $0xd8] sm:$0xff]  ;;  %v181_v27 = vld [vmem:[%s717_s4 + $0xd0] sm:$0xff]  ;;  %v184_v28 = vld [vmem:[%s717_s4 + $0xe8] sm:$0xff]  ;;  %p508_p2 = por %p507_p13, %p506_p6 }
  0x44   : > { %v183_v29 = vld [vmem:[%s717_s4 + $0xe0] sm:$0xff]  ;;  %v186_v30 = vld [vmem:[%s717_s4 + $0xf8] sm:$0xff]  ;;  %v185_v31 = vld [vmem:[%s717_s4 + $0xf0] sm:$0xff] }
  0x45   : > { %p509_p5 = pnand %p508_p2, %p502_p0 }
  0x47   : > { %222 = vxpose.xlu1.b32.cont [4/16] %v162_v6, 128  ;;  %190 = vxpose.xlu0.b32.cont [4/16] %v161_v7, 128 }
  0x4b   : > { %223 = vxpose.xlu1.b32.cont [5/16] %v164_v8, 128  ;;  %191 = vxpose.xlu0.b32.cont [5/16] %v163_v9, 128 }
  0x4f   : > { %224 = vxpose.xlu1.b32.cont [6/16] %v166_v10, 128  ;;  %192 = vxpose.xlu0.b32.cont [6/16] %v165_v11, 128 }
  0x53   : > { %225 = vxpose.xlu1.b32.cont [7/16] %v168_v12, 128  ;;  %193 = vxpose.xlu0.b32.cont [7/16] %v167_v13, 128 }
  0x57   : > { %226 = vxpose.xlu1.b32.cont [8/16] %v170_v14, 128  ;;  %194 = vxpose.xlu0.b32.cont [8/16] %v169_v15, 128 }
  0x5b   : > { %227 = vxpose.xlu1.b32.cont [9/16] %v172_v16, 128  ;;  %195 = vxpose.xlu0.b32.cont [9/16] %v171_v17, 128 }
  0x5f   : > { %228 = vxpose.xlu1.b32.cont [10/16] %v174_v18, 128  ;;  %196 = vxpose.xlu0.b32.cont [10/16] %v173_v19, 128 }
  0x63   : > { %229 = vxpose.xlu1.b32.cont [11/16] %v176_v20, 128  ;;  %197 = vxpose.xlu0.b32.cont [11/16] %v175_v21, 128 }
  0x67   : > { %230 = vxpose.xlu1.b32.cont [12/16] %v178_v22, 128  ;;  %198 = vxpose.xlu0.b32.cont [12/16] %v177_v23, 128 }
  0x6b   : > { %231 = vxpose.xlu1.b32.cont [13/16] %v180_v24, 128  ;;  %199 = vxpose.xlu0.b32.cont [13/16] %v179_v25, 128 }
  0x6f   : > { %232 = vxpose.xlu1.b32.cont [14/16] %v182_v26, 128  ;;  %200 = vxpose.xlu0.b32.cont [14/16] %v181_v27, 128 }
  0x73   : > { %233 = vxpose.xlu1.b32.cont [15/16] %v184_v28, 128  ;;  %201 = vxpose.xlu0.b32.cont [15/16] %v183_v29, 128 }
  0x77   : > { %234 = vxpose.xlu1.b32.end [16/16] %v186_v30, 128  ;;  %202 = vxpose.xlu0.b32.end [16/16] %v185_v31, 128 }
  0xbb   : > { %v235_v32 = vpop.trf.xlu1  ;;  %v203_v33 = vpop.trf.xlu0 }
  0xbc   : > { %267 = vst [vmem:[%s757_s18 + $0x80] sm:$0xff] %v235_v32  ;;  %251 = vst [vmem:[%s757_s18] sm:$0xff] %v203_v33 }
  0xbf   : > { %v236_v34 = vpop.trf.xlu1  ;;  %v204_v35 = vpop.trf.xlu0 }
  0xc0   : > { %268 = vst [vmem:[%s757_s18 + $0x88] sm:$0xff] %v236_v34  ;;  %252 = vst [vmem:[%s757_s18 + $0x8] sm:$0xff] %v204_v35 }
  0xc3   : > { %v237_v36 = vpop.trf.xlu1  ;;  %v205_v37 = vpop.trf.xlu0 }
  0xc4   : > { %269 = vst [vmem:[%s757_s18 + $0x90] sm:$0xff] %v237_v36  ;;  %253 = vst [vmem:[%s757_s18 + $0x10] sm:$0xff] %v205_v37 }
  0xc7   : > { %v238_v38 = vpop.trf.xlu1  ;;  %v206_v39 = vpop.trf.xlu0 }
  0xc8   : > { %270 = vst [vmem:[%s757_s18 + $0x98] sm:$0xff] %v238_v38  ;;  %254 = vst [vmem:[%s757_s18 + $0x18] sm:$0xff] %v206_v39 }
  0xcb   : > { %v239_v40 = vpop.trf.xlu1  ;;  %v207_v41 = vpop.trf.xlu0 }
  0xcc   : > { %271 = vst [vmem:[%s757_s18 + $0xa0] sm:$0xff] %v239_v40  ;;  %255 = vst [vmem:[%s757_s18 + $0x20] sm:$0xff] %v207_v41 }
  0xcf   : > { %v240_v42 = vpop.trf.xlu1  ;;  %v208_v43 = vpop.trf.xlu0 }
  0xd0   : > { %272 = vst [vmem:[%s757_s18 + $0xa8] sm:$0xff] %v240_v42  ;;  %256 = vst [vmem:[%s757_s18 + $0x28] sm:$0xff] %v208_v43 }
  0xd3   : > { %v241_v44 = vpop.trf.xlu1  ;;  %v209_v45 = vpop.trf.xlu0 }
  0xd4   : > { %273 = vst [vmem:[%s757_s18 + $0xb0] sm:$0xff] %v241_v44  ;;  %257 = vst [vmem:[%s757_s18 + $0x30] sm:$0xff] %v209_v45 }
  0xd7   : > { %v242_v46 = vpop.trf.xlu1  ;;  %v210_v47 = vpop.trf.xlu0 }
  0xd8   : > { %274 = vst [vmem:[%s757_s18 + $0xb8] sm:$0xff] %v242_v46  ;;  %258 = vst [vmem:[%s757_s18 + $0x38] sm:$0xff] %v210_v47 }
  0xdb   : > { %v243_v48 = vpop.trf.xlu1  ;;  %v211_v49 = vpop.trf.xlu0 }
  0xdc   : > { %275 = vst [vmem:[%s757_s18 + $0xc0] sm:$0xff] %v243_v48  ;;  %259 = vst [vmem:[%s757_s18 + $0x40] sm:$0xff] %v211_v49 }
  0xdf   : > { %v244_v50 = vpop.trf.xlu1  ;;  %v212_v51 = vpop.trf.xlu0 }
  0xe0   : > { %276 = vst [vmem:[%s757_s18 + $0xc8] sm:$0xff] %v244_v50  ;;  %260 = vst [vmem:[%s757_s18 + $0x48] sm:$0xff] %v212_v51 }
  0xe3   : > { %v245_v52 = vpop.trf.xlu1  ;;  %v213_v53 = vpop.trf.xlu0 }
  0xe4   : > { %277 = vst [vmem:[%s757_s18 + $0xd0] sm:$0xff] %v245_v52  ;;  %261 = vst [vmem:[%s757_s18 + $0x50] sm:$0xff] %v213_v53 }
  0xe7   : > { %v246_v54 = vpop.trf.xlu1  ;;  %v214_v55 = vpop.trf.xlu0 }
  0xe8   : > { %278 = vst [vmem:[%s757_s18 + $0xd8] sm:$0xff] %v246_v54  ;;  %262 = vst [vmem:[%s757_s18 + $0x58] sm:$0xff] %v214_v55 }
  0xeb   : > { %v247_v56 = vpop.trf.xlu1  ;;  %v215_v57 = vpop.trf.xlu0 }
  0xec   : > { %279 = vst [vmem:[%s757_s18 + $0xe0] sm:$0xff] %v247_v56  ;;  %263 = vst [vmem:[%s757_s18 + $0x60] sm:$0xff] %v215_v57 }
  0xef   : > { %v248_v58 = vpop.trf.xlu1  ;;  %v216_v59 = vpop.trf.xlu0 }
  0xf0   : > { %280 = vst [vmem:[%s757_s18 + $0xe8] sm:$0xff] %v248_v58  ;;  %264 = vst [vmem:[%s757_s18 + $0x68] sm:$0xff] %v216_v59 }
  0xf3   : > { %v249_v60 = vpop.trf.xlu1  ;;  %v217_v61 = vpop.trf.xlu0 }
  0xf4   : > { %281 = vst [vmem:[%s757_s18 + $0xf0] sm:$0xff] %v249_v60  ;;  %265 = vst [vmem:[%s757_s18 + $0x70] sm:$0xff] %v217_v61 }
  0xf7   : > { %v250_v62 = vpop.trf.xlu1  ;;  %v218_v63 = vpop.trf.xlu0 }
  0xf8   : > { %282 = vst [vmem:[%s757_s18 + $0xf8] sm:$0xff] %v250_v62  ;;  %266 = vst [vmem:[%s757_s18 + $0x78] sm:$0xff] %v218_v63 }
  0xf9   : > { %512 = shalt.err (!%p509_p5)
}
  0xfa   : > { %s513_s17 = scalar_lea.hbm %s794_s5, 4096  ;;  %s517_s24 = scalar_lea.hbm %s848_s1, 8192 }
  0xfb   : > { %p514_p4 = scmp.ne.s32.totalorder %s794_s5, %s513_s17  ;;  %p518_p12 = scmp.lt.u32.totalorder %s794_s5, %s848_s1 }
  0xfc   : > { %p519_p1 = scmp.lt.u32.totalorder %s517_s24, %s513_s17  ;;  %p521_p8 = scmp.lt.u32.totalorder %s513_s17, %s794_s5 }
  0xfd   : > { %p515_p7 = pnand %p514_p4, %p856_p9 }
  0xfe   : > { %p520_p3 = por %p519_p1, %p518_p12 }
  0xff   : > { %p516_p10 = pneg %p515_p7 }
 0x100   : > { %p522_p11 = por %p521_p8, %p520_p3 }
 0x102   : > { %p523_p0 = pnand %p522_p11, %p516_p10 }
 0x104   : > { %526 = shalt.err (!%p523_p0)
}
 0x105   : > { %s587_s3 = smov 128   ;;  %s588_s4 = smov 8  }
 0x106   : > { %405 = dma.vmem_to_hbm [thread:$0]  (%p856_p9), %s796_s29, 4096, %s794_s5, %s284_s9, %s587_s3, %s587_s3, %s588_s4  }
 0x107 PF: > { %s314_s18 = sand.u32 1, %s561_s6   ;;  %p857_p6 = scmp.ne.s32.totalorder %s853_s21, 0 }
 0x108   : > { %p858_p13 = scmp.ge.s32.totalorder %s581_s11, 2  ;;  %s315_s27 = scalar_lea.sflag [#allocation4], %s314_s18 }
 0x10a   : > { %p412_p2 = pnand %p858_p13, %p857_p6 }
 0x10c   : > { %556 = dma.done.wait (!%p412_p2), %s315_s27, 4096  }
 0x10d   : > { %558 = vsyncadd (!%p412_p2), %s315_s27, 4294963200  ;;  %s17_s11 = sadd.s32 1, %s581_s11   ;;  %s859_s6 = smov %s565_s7 }
 0x10e   : > { %p14_p5 = scmp.ge.s32.totalorder %s17_s11, 4   ;;  %s860_s7 = smov %s569_s8 }
 0x10f   : > { %s861_s8 = smov %s655_s20  ;;  %s862_s9 = smov %s577_s10 }
 0x110   : > { %s863_s10 = smov %s865_s14  ;;  %16 = sbr.rel (!%p14_p5) target bundleno = 6 (0x6), region = 69 }
 0x117   :  { %320 = vsyncpa [#allocation3], 1 }
 0x118   :  { %322 = vsyncpa [#allocation3 + $0x1], 1 }
 0x119   :  { %323 = vsyncpa [#allocation4], 1 }
 0x11a   :  { %325 = vsyncpa [#allocation4 + $0x1], 1 }

</bundles_post_ra>
